<compile_context>
chip_gen: v5e
topology: v5e:2x2
jax: 0.10.0
libtpu: 0.0.40
codegen_flags: <defaults>
</compile_context>

<pallas_src>
import jax
import jax.numpy as jnp
from jax.experimental import pallas as pl
from jax.experimental.pallas import tpu as pltpu

HIDDEN = 32
HEADS = 4
HEAD_DIM = HIDDEN // HEADS
MLP_HIDDEN = int(HIDDEN * 4.0)
EPS = 1e-6
SCALE = HEAD_DIM ** (-0.5)


def dit_block_kernel(x_ref, c_ref,
                     w_ada_ref, b_ada_ref, w_qkv_ref, b_qkv_ref,
                     w_proj_ref, b_proj_ref, w_fc1_ref, b_fc1_ref,
                     w_fc2_ref, b_fc2_ref, o_ref):
    D, H, HD = HIDDEN, HEADS, HEAD_DIM

    x = x_ref[...]                        # (N, D)  one batch element
    c = c_ref[...]                        # (1, D)  its condition vector

    # ------------- adaLN-Zero modulation from the condition vector -------------
    silu_c = c * jax.nn.sigmoid(c)
    mod = jnp.dot(silu_c, w_ada_ref[...],
                  preferred_element_type=jnp.float32) + b_ada_ref[...]   # (1, 6D)
    shift_msa = mod[:, 0 * D:1 * D]
    scale_msa = mod[:, 1 * D:2 * D]
    gate_msa = mod[:, 2 * D:3 * D]
    shift_mlp = mod[:, 3 * D:4 * D]
    scale_mlp = mod[:, 4 * D:5 * D]
    gate_mlp = mod[:, 5 * D:6 * D]

    def layernorm(v):
        # LayerNorm(elementwise_affine=False, eps=1e-6), biased variance
        mu = jnp.mean(v, axis=-1, keepdims=True)
        d = v - mu
        var = jnp.mean(d * d, axis=-1, keepdims=True)
        return d * jax.lax.rsqrt(var + EPS)

    # ------------------------- self-attention branch ---------------------------
    h = layernorm(x) * (1.0 + scale_msa) + shift_msa                     # (N, D)
    qkv = jnp.dot(h, w_qkv_ref[...],
                  preferred_element_type=jnp.float32) + b_qkv_ref[...]   # (N, 3D)

    # timm layout: qkv columns = (qkv_idx, head, head_dim).  q columns were
    # pre-scaled by HEAD_DIM**-0.5 in pack_params.  Fully unrolled per-head
    # loop on static, lane-contiguous column slices (no einshape transposes).
    head_outs = []
    for hh in range(H):
        q = qkv[:, hh * HD:(hh + 1) * HD]                     # (N, HD)
        k = qkv[:, (H + hh) * HD:(H + hh + 1) * HD]           # (N, HD)
        v = qkv[:, (2 * H + hh) * HD:(2 * H + hh + 1) * HD]   # (N, HD)
        s = jnp.dot(q, k.T, preferred_element_type=jnp.float32)          # (N, N)
        s = s - jnp.max(s, axis=-1, keepdims=True)
        p = jnp.exp(s)
        p = p * (1.0 / jnp.sum(p, axis=-1, keepdims=True))    # one exact divide / row
        head_outs.append(jnp.dot(p, v, preferred_element_type=jnp.float32))
    attn = jnp.concatenate(head_outs, axis=1)                             # (N, D)
    attn = jnp.dot(attn, w_proj_ref[...],
                   preferred_element_type=jnp.float32) + b_proj_ref[...]  # (N, D)
    x = x + gate_msa * attn

    # ------------------------ MLP branch (tanh GELU) ---------------------------
    h = layernorm(x) * (1.0 + scale_mlp) + shift_mlp
    h1 = jnp.dot(h, w_fc1_ref[...],
                 preferred_element_type=jnp.float32) + b_fc1_ref[...]     # (N, 4D)
    h1 = jax.nn.gelu(h1, approximate=True)
    h2 = jnp.dot(h1, w_fc2_ref[...],
                 preferred_element_type=jnp.float32) + b_fc2_ref[...]     # (N, D)
    o_ref[...] = x + gate_mlp * h2


def pack_params(params):
    """One-time parameter packing (outside the per-call hot path):
    fold the attention scale into the q projection and make all biases 2-D."""
    D = HIDDEN
    w_qkv = params["w_qkv"].at[:, :D].multiply(SCALE)
    b_qkv = params["b_qkv"].at[:D].multiply(SCALE)
    return {
        "w_ada": params["w_ada"], "b_ada": params["b_ada"][None, :],
        "w_qkv": w_qkv, "b_qkv": b_qkv[None, :],
        "w_proj": params["w_proj"], "b_proj": params["b_proj"][None, :],
        "w_fc1": params["w_fc1"], "b_fc1": params["b_fc1"][None, :],
        "w_fc2": params["w_fc2"], "b_fc2": params["b_fc2"][None, :],
    }


def dit_block(x, c, pp):
    B, N, D = x.shape
    assert D == HIDDEN

    c3 = c[:, None, :]                    # (B, 1, D) so the per-step block is (1, D)

    weight_keys = ["w_ada", "b_ada", "w_qkv", "b_qkv", "w_proj", "b_proj",
                   "w_fc1", "b_fc1", "w_fc2", "b_fc2"]
    weights = [pp[k] for k in weight_keys]
    # Whole-array, grid-invariant blocks: same block index each step, so Pallas
    # DMAs each weight into VMEM once and keeps it resident across the grid.
    w_specs = [pl.BlockSpec(w.shape, lambda b: (0, 0)) for w in weights]

    out = pl.pallas_call(
        dit_block_kernel,
        out_shape=jax.ShapeDtypeStruct((B, N, D), jnp.float32),
        grid_spec=pltpu.PrefetchScalarGridSpec(
            num_scalar_prefetch=0,
            grid=(B,),                                   # one batch row per step
            in_specs=[
                pl.BlockSpec((None, N, D), lambda b: (b, 0, 0)),   # x     -> (N, D)
                pl.BlockSpec((None, 1, D), lambda b: (b, 0, 0)),   # c     -> (1, D)
            ] + w_specs,
            out_specs=pl.BlockSpec((None, N, D), lambda b: (b, 0, 0)),
        ),
        compiler_params=pltpu.CompilerParams(
            dimension_semantics=("parallel",)),          # shards over v7x's 2 TCs
    )(x, c3, *weights)
    return out


# ---------------- pure-JAX reference (matches PyTorch DiTBlock semantics) ----------------
def dit_block_ref(x, c, p):
    B, N, D = x.shape

    mod = jax.nn.silu(c) @ p["w_ada"] + p["b_ada"]               # (B, 6D)
    shift_msa, scale_msa, gate_msa, shift_mlp, scale_mlp, gate_mlp = jnp.split(mod, 6, axis=1)

    def layernorm(v):
        mu = jnp.mean(v, axis=-1, keepdims=True)
        d = v - mu
        var = jnp.mean(d * d, axis=-1, keepdims=True)
        return d * jax.lax.rsqrt(var + EPS)

    def modulate(v, shift, scale):
        return v * (1.0 + scale[:, None, :]) + shift[:, None, :]

    # attention (timm Attention, qkv_bias=True, no qk-norm, dropout p=0)
    h = modulate(layernorm(x), shift_msa, scale_msa)
    qkv = (h @ p["w_qkv"] + p["b_qkv"]).reshape(B, N, 3, HEADS, HEAD_DIM)
    qkv = jnp.transpose(qkv, (2, 0, 3, 1, 4))
    q, k, v = qkv[0], qkv[1], qkv[2]                             # (B, H, N, hd)
    s = (q * SCALE) @ jnp.swapaxes(k, -2, -1)                    # (B, H, N, N)
    a = jax.nn.softmax(s, axis=-1) @ v                           # (B, H, N, hd)
    a = jnp.transpose(a, (0, 2, 1, 3)).reshape(B, N, D)
    a = a @ p["w_proj"] + p["b_proj"]
    x = x + gate_msa[:, None, :] * a

    # MLP (fc1 -> tanh GELU -> fc2, dropout p=0)
    h = modulate(layernorm(x), shift_mlp, scale_mlp)
    h = jax.nn.gelu(h @ p["w_fc1"] + p["b_fc1"], approximate=True)
    h = h @ p["w_fc2"] + p["b_fc2"]
    x = x + gate_mlp[:, None, :] * h
    return x


def make_params(key):
    D, MLP = HIDDEN, MLP_HIDDEN
    ks = iter(jax.random.split(key, 16))

    def w(din, dout):
        return jax.random.normal(next(ks), (din, dout), jnp.float32) * 0.05

    def b(dout):
        return jax.random.normal(next(ks), (dout,), jnp.float32) * 0.05

    return {
        "w_ada": w(D, 6 * D), "b_ada": b(6 * D),
        "w_qkv": w(D, 3 * D), "b_qkv": b(3 * D),
        "w_proj": w(D, D), "b_proj": b(D),
        "w_fc1": w(D, MLP), "b_fc1": b(MLP),
        "w_fc2": w(MLP, D), "b_fc2": b(D),
    }


if __name__ == "__main__":
    B, N = 2, 8
    key = jax.random.PRNGKey(0)
    kx, kc, kp = jax.random.split(key, 3)
    x = jax.random.normal(kx, (B, N, HIDDEN), jnp.float32)
    c = jax.random.normal(kc, (B, HIDDEN), jnp.float32)
    params = make_params(kp)
    packed = pack_params(params)   # one-time packing, outside the per-call path

    out = jax.block_until_ready(dit_block(x, c, packed))
    ref = jax.block_until_ready(dit_block_ref(x, c, params))

    assert out.shape == (B, N, HIDDEN)
    max_err = float(jnp.max(jnp.abs(out - ref)))
    assert jnp.allclose(out, ref, atol=1e-4, rtol=1e-4), f"max abs err = {max_err}"
    print("KERNEL_OK")
</pallas_src>

<mosaic_0001>
module attributes {stable_mosaic.version = 11 : i64} {
  func.func @dit_block_kernel(%arg0: i32, %arg1: memref<1x8x32xf32, #tpu.memory_space<vmem>>, %arg2: memref<1x1x32xf32, #tpu.memory_space<vmem>>, %arg3: memref<32x192xf32, #tpu.memory_space<vmem>>, %arg4: memref<1x192xf32, #tpu.memory_space<vmem>>, %arg5: memref<32x96xf32, #tpu.memory_space<vmem>>, %arg6: memref<1x96xf32, #tpu.memory_space<vmem>>, %arg7: memref<32x32xf32, #tpu.memory_space<vmem>>, %arg8: memref<1x32xf32, #tpu.memory_space<vmem>>, %arg9: memref<32x128xf32, #tpu.memory_space<vmem>>, %arg10: memref<1x128xf32, #tpu.memory_space<vmem>>, %arg11: memref<128x32xf32, #tpu.memory_space<vmem>>, %arg12: memref<1x32xf32, #tpu.memory_space<vmem>>, %arg13: memref<1x8x32xf32, #tpu.memory_space<vmem>>) attributes {dimension_semantics = [#tpu.dimension_semantics<parallel>], iteration_bounds = array<i64: 2>, scalar_prefetch = 0 : i64, scratch_operands = 0 : i64, tpu.core_type = #tpu.core_type<tc>, window_params = [{transform_indices = @transform_0, window_bounds = array<i64: 1, 8, 32>}, {transform_indices = @transform_1, window_bounds = array<i64: 1, 1, 32>}, {pipeline_mode = #tpu.pipeline_mode<synchronous>, transform_indices = @transform_2, window_bounds = array<i64: 32, 192>}, {pipeline_mode = #tpu.pipeline_mode<synchronous>, transform_indices = @transform_3, window_bounds = array<i64: 1, 192>}, {pipeline_mode = #tpu.pipeline_mode<synchronous>, transform_indices = @transform_4, window_bounds = array<i64: 32, 96>}, {pipeline_mode = #tpu.pipeline_mode<synchronous>, transform_indices = @transform_5, window_bounds = array<i64: 1, 96>}, {pipeline_mode = #tpu.pipeline_mode<synchronous>, transform_indices = @transform_6, window_bounds = array<i64: 32, 32>}, {pipeline_mode = #tpu.pipeline_mode<synchronous>, transform_indices = @transform_7, window_bounds = array<i64: 1, 32>}, {pipeline_mode = #tpu.pipeline_mode<synchronous>, transform_indices = @transform_8, window_bounds = array<i64: 32, 128>}, {pipeline_mode = #tpu.pipeline_mode<synchronous>, transform_indices = @transform_9, window_bounds = array<i64: 1, 128>}, {pipeline_mode = #tpu.pipeline_mode<synchronous>, transform_indices = @transform_10, window_bounds = array<i64: 128, 32>}, {pipeline_mode = #tpu.pipeline_mode<synchronous>, transform_indices = @transform_11, window_bounds = array<i64: 1, 32>}, {transform_indices = @transform_12, window_bounds = array<i64: 1, 8, 32>}]} {
    %c0 = arith.constant 0 : index
    %c0_0 = arith.constant 0 : index
    %c0_1 = arith.constant 0 : index
    %0 = vector.load %arg1[%c0, %c0_0, %c0_1] : memref<1x8x32xf32, #tpu.memory_space<vmem>>, vector<1x8x32xf32>
    %1 = vector.shape_cast %0 : vector<1x8x32xf32> to vector<8x32xf32>
    %c0_2 = arith.constant 0 : index
    %c0_3 = arith.constant 0 : index
    %c0_4 = arith.constant 0 : index
    %2 = vector.load %arg2[%c0_2, %c0_3, %c0_4] : memref<1x1x32xf32, #tpu.memory_space<vmem>>, vector<1x1x32xf32>
    %3 = vector.shape_cast %2 : vector<1x1x32xf32> to vector<1x32xf32>
    %4 = arith.negf %3 : vector<1x32xf32>
    %5 = math.exp %4 : vector<1x32xf32>
    %cst = arith.constant 1.000000e+00 : f32
    %6 = vector.broadcast %cst : f32 to vector<1x32xf32>
    %7 = arith.addf %6, %5 : vector<1x32xf32>
    %8 = arith.divf %6, %7 : vector<1x32xf32>
    %9 = arith.mulf %3, %8 : vector<1x32xf32>
    %c0_5 = arith.constant 0 : index
    %c0_6 = arith.constant 0 : index
    %10 = vector.load %arg3[%c0_5, %c0_6] : memref<32x192xf32, #tpu.memory_space<vmem>>, vector<32x192xf32>
    %cst_7 = arith.constant dense<0.000000e+00> : vector<1x192xf32>
    %11 = tpu.matmul %9, %10, %cst_7 {dimension_numbers = #tpu.dot_dimension_numbers<[1], [0], [0], [1], [0, 0, 1, 1], [], []>} : vector<1x32xf32>, vector<32x192xf32>, vector<1x192xf32> -> vector<1x192xf32>
    %c0_8 = arith.constant 0 : index
    %c0_9 = arith.constant 0 : index
    %12 = vector.load %arg4[%c0_8, %c0_9] : memref<1x192xf32, #tpu.memory_space<vmem>>, vector<1x192xf32>
    %13 = arith.addf %11, %12 : vector<1x192xf32>
    %14 = vector.extract_strided_slice %13 {offsets = [0, 0], sizes = [1, 32], strides = [1, 1]} : vector<1x192xf32> to vector<1x32xf32>
    %15 = vector.extract_strided_slice %13 {offsets = [0, 32], sizes = [1, 32], strides = [1, 1]} : vector<1x192xf32> to vector<1x32xf32>
    %16 = vector.extract_strided_slice %13 {offsets = [0, 64], sizes = [1, 32], strides = [1, 1]} : vector<1x192xf32> to vector<1x32xf32>
    %17 = vector.extract_strided_slice %13 {offsets = [0, 96], sizes = [1, 32], strides = [1, 1]} : vector<1x192xf32> to vector<1x32xf32>
    %18 = vector.extract_strided_slice %13 {offsets = [0, 128], sizes = [1, 32], strides = [1, 1]} : vector<1x192xf32> to vector<1x32xf32>
    %19 = vector.extract_strided_slice %13 {offsets = [0, 160], sizes = [1, 32], strides = [1, 1]} : vector<1x192xf32> to vector<1x32xf32>
    %cst_10 = arith.constant dense<0.000000e+00> : vector<8xf32>
    %20 = vector.multi_reduction <add>, %1, %cst_10 [1] : vector<8x32xf32> to vector<8xf32>
    %21 = vector.shape_cast %20 : vector<8xf32> to vector<8x1xf32>
    %cst_11 = arith.constant 3.200000e+01 : f32
    %22 = vector.broadcast %cst_11 : f32 to vector<8x1xf32>
    %23 = arith.divf %21, %22 : vector<8x1xf32>
    %24 = vector.broadcast %23 : vector<8x1xf32> to vector<8x32xf32>
    %25 = arith.subf %1, %24 : vector<8x32xf32>
    %26 = arith.mulf %25, %25 : vector<8x32xf32>
    %cst_12 = arith.constant dense<0.000000e+00> : vector<8xf32>
    %27 = vector.multi_reduction <add>, %26, %cst_12 [1] : vector<8x32xf32> to vector<8xf32>
    %28 = vector.shape_cast %27 : vector<8xf32> to vector<8x1xf32>
    %cst_13 = arith.constant 3.200000e+01 : f32
    %29 = vector.broadcast %cst_13 : f32 to vector<8x1xf32>
    %30 = arith.divf %28, %29 : vector<8x1xf32>
    %cst_14 = arith.constant 9.99999997E-7 : f32
    %31 = vector.broadcast %cst_14 : f32 to vector<8x1xf32>
    %32 = arith.addf %30, %31 : vector<8x1xf32>
    %33 = math.rsqrt %32 : vector<8x1xf32>
    %34 = vector.broadcast %33 : vector<8x1xf32> to vector<8x32xf32>
    %35 = arith.mulf %25, %34 : vector<8x32xf32>
    %cst_15 = arith.constant 1.000000e+00 : f32
    %36 = vector.broadcast %cst_15 : f32 to vector<1x32xf32>
    %37 = arith.addf %36, %15 : vector<1x32xf32>
    %38 = vector.broadcast %37 : vector<1x32xf32> to vector<8x32xf32>
    %39 = arith.mulf %35, %38 : vector<8x32xf32>
    %40 = vector.broadcast %14 : vector<1x32xf32> to vector<8x32xf32>
    %41 = arith.addf %39, %40 : vector<8x32xf32>
    %c0_16 = arith.constant 0 : index
    %c0_17 = arith.constant 0 : index
    %42 = vector.load %arg5[%c0_16, %c0_17] : memref<32x96xf32, #tpu.memory_space<vmem>>, vector<32x96xf32>
    %cst_18 = arith.constant dense<0.000000e+00> : vector<8x96xf32>
    %43 = tpu.matmul %41, %42, %cst_18 {dimension_numbers = #tpu.dot_dimension_numbers<[1], [0], [0], [1], [0, 0, 1, 1], [], []>} : vector<8x32xf32>, vector<32x96xf32>, vector<8x96xf32> -> vector<8x96xf32>
    %c0_19 = arith.constant 0 : index
    %c0_20 = arith.constant 0 : index
    %44 = vector.load %arg6[%c0_19, %c0_20] : memref<1x96xf32, #tpu.memory_space<vmem>>, vector<1x96xf32>
    %45 = vector.broadcast %44 : vector<1x96xf32> to vector<8x96xf32>
    %46 = arith.addf %43, %45 : vector<8x96xf32>
    %47 = vector.extract_strided_slice %46 {offsets = [0, 0], sizes = [8, 8], strides = [1, 1]} : vector<8x96xf32> to vector<8x8xf32>
    %48 = vector.extract_strided_slice %46 {offsets = [0, 32], sizes = [8, 8], strides = [1, 1]} : vector<8x96xf32> to vector<8x8xf32>
    %49 = vector.extract_strided_slice %46 {offsets = [0, 64], sizes = [8, 8], strides = [1, 1]} : vector<8x96xf32> to vector<8x8xf32>
    %50 = tpu.transpose %48, [1, 0] : vector<8x8xf32> -> vector<8x8xf32>
    %cst_21 = arith.constant dense<0.000000e+00> : vector<8x8xf32>
    %51 = tpu.matmul %47, %50, %cst_21 {dimension_numbers = #tpu.dot_dimension_numbers<[1], [0], [0], [1], [0, 0, 1, 1], [], []>} : vector<8x8xf32>, vector<8x8xf32>, vector<8x8xf32> -> vector<8x8xf32>
    %cst_22 = arith.constant dense<0xFF800000> : vector<8xf32>
    %52 = vector.multi_reduction <maximumf>, %51, %cst_22 [1] : vector<8x8xf32> to vector<8xf32>
    %53 = vector.shape_cast %52 : vector<8xf32> to vector<8x1xf32>
    %54 = vector.broadcast %53 : vector<8x1xf32> to vector<8x8xf32>
    %55 = arith.subf %51, %54 : vector<8x8xf32>
    %56 = math.exp %55 : vector<8x8xf32>
    %cst_23 = arith.constant dense<0.000000e+00> : vector<8xf32>
    %57 = vector.multi_reduction <add>, %56, %cst_23 [1] : vector<8x8xf32> to vector<8xf32>
    %58 = vector.shape_cast %57 : vector<8xf32> to vector<8x1xf32>
    %cst_24 = arith.constant 1.000000e+00 : f32
    %59 = vector.broadcast %cst_24 : f32 to vector<8x1xf32>
    %60 = arith.divf %59, %58 : vector<8x1xf32>
    %61 = vector.broadcast %60 : vector<8x1xf32> to vector<8x8xf32>
    %62 = arith.mulf %56, %61 : vector<8x8xf32>
    %cst_25 = arith.constant dense<0.000000e+00> : vector<8x8xf32>
    %63 = tpu.matmul %62, %49, %cst_25 {dimension_numbers = #tpu.dot_dimension_numbers<[1], [0], [0], [1], [0, 0, 1, 1], [], []>} : vector<8x8xf32>, vector<8x8xf32>, vector<8x8xf32> -> vector<8x8xf32>
    %64 = vector.extract_strided_slice %46 {offsets = [0, 8], sizes = [8, 8], strides = [1, 1]} : vector<8x96xf32> to vector<8x8xf32>
    %65 = vector.extract_strided_slice %46 {offsets = [0, 40], sizes = [8, 8], strides = [1, 1]} : vector<8x96xf32> to vector<8x8xf32>
    %66 = vector.extract_strided_slice %46 {offsets = [0, 72], sizes = [8, 8], strides = [1, 1]} : vector<8x96xf32> to vector<8x8xf32>
    %67 = tpu.transpose %65, [1, 0] : vector<8x8xf32> -> vector<8x8xf32>
    %cst_26 = arith.constant dense<0.000000e+00> : vector<8x8xf32>
    %68 = tpu.matmul %64, %67, %cst_26 {dimension_numbers = #tpu.dot_dimension_numbers<[1], [0], [0], [1], [0, 0, 1, 1], [], []>} : vector<8x8xf32>, vector<8x8xf32>, vector<8x8xf32> -> vector<8x8xf32>
    %cst_27 = arith.constant dense<0xFF800000> : vector<8xf32>
    %69 = vector.multi_reduction <maximumf>, %68, %cst_27 [1] : vector<8x8xf32> to vector<8xf32>
    %70 = vector.shape_cast %69 : vector<8xf32> to vector<8x1xf32>
    %71 = vector.broadcast %70 : vector<8x1xf32> to vector<8x8xf32>
    %72 = arith.subf %68, %71 : vector<8x8xf32>
    %73 = math.exp %72 : vector<8x8xf32>
    %cst_28 = arith.constant dense<0.000000e+00> : vector<8xf32>
    %74 = vector.multi_reduction <add>, %73, %cst_28 [1] : vector<8x8xf32> to vector<8xf32>
    %75 = vector.shape_cast %74 : vector<8xf32> to vector<8x1xf32>
    %cst_29 = arith.constant 1.000000e+00 : f32
    %76 = vector.broadcast %cst_29 : f32 to vector<8x1xf32>
    %77 = arith.divf %76, %75 : vector<8x1xf32>
    %78 = vector.broadcast %77 : vector<8x1xf32> to vector<8x8xf32>
    %79 = arith.mulf %73, %78 : vector<8x8xf32>
    %cst_30 = arith.constant dense<0.000000e+00> : vector<8x8xf32>
    %80 = tpu.matmul %79, %66, %cst_30 {dimension_numbers = #tpu.dot_dimension_numbers<[1], [0], [0], [1], [0, 0, 1, 1], [], []>} : vector<8x8xf32>, vector<8x8xf32>, vector<8x8xf32> -> vector<8x8xf32>
    %81 = vector.extract_strided_slice %46 {offsets = [0, 16], sizes = [8, 8], strides = [1, 1]} : vector<8x96xf32> to vector<8x8xf32>
    %82 = vector.extract_strided_slice %46 {offsets = [0, 48], sizes = [8, 8], strides = [1, 1]} : vector<8x96xf32> to vector<8x8xf32>
    %83 = vector.extract_strided_slice %46 {offsets = [0, 80], sizes = [8, 8], strides = [1, 1]} : vector<8x96xf32> to vector<8x8xf32>
    %84 = tpu.transpose %82, [1, 0] : vector<8x8xf32> -> vector<8x8xf32>
    %cst_31 = arith.constant dense<0.000000e+00> : vector<8x8xf32>
    %85 = tpu.matmul %81, %84, %cst_31 {dimension_numbers = #tpu.dot_dimension_numbers<[1], [0], [0], [1], [0, 0, 1, 1], [], []>} : vector<8x8xf32>, vector<8x8xf32>, vector<8x8xf32> -> vector<8x8xf32>
    %cst_32 = arith.constant dense<0xFF800000> : vector<8xf32>
    %86 = vector.multi_reduction <maximumf>, %85, %cst_32 [1] : vector<8x8xf32> to vector<8xf32>
    %87 = vector.shape_cast %86 : vector<8xf32> to vector<8x1xf32>
    %88 = vector.broadcast %87 : vector<8x1xf32> to vector<8x8xf32>
    %89 = arith.subf %85, %88 : vector<8x8xf32>
    %90 = math.exp %89 : vector<8x8xf32>
    %cst_33 = arith.constant dense<0.000000e+00> : vector<8xf32>
    %91 = vector.multi_reduction <add>, %90, %cst_33 [1] : vector<8x8xf32> to vector<8xf32>
    %92 = vector.shape_cast %91 : vector<8xf32> to vector<8x1xf32>
    %cst_34 = arith.constant 1.000000e+00 : f32
    %93 = vector.broadcast %cst_34 : f32 to vector<8x1xf32>
    %94 = arith.divf %93, %92 : vector<8x1xf32>
    %95 = vector.broadcast %94 : vector<8x1xf32> to vector<8x8xf32>
    %96 = arith.mulf %90, %95 : vector<8x8xf32>
    %cst_35 = arith.constant dense<0.000000e+00> : vector<8x8xf32>
    %97 = tpu.matmul %96, %83, %cst_35 {dimension_numbers = #tpu.dot_dimension_numbers<[1], [0], [0], [1], [0, 0, 1, 1], [], []>} : vector<8x8xf32>, vector<8x8xf32>, vector<8x8xf32> -> vector<8x8xf32>
    %98 = vector.extract_strided_slice %46 {offsets = [0, 24], sizes = [8, 8], strides = [1, 1]} : vector<8x96xf32> to vector<8x8xf32>
    %99 = vector.extract_strided_slice %46 {offsets = [0, 56], sizes = [8, 8], strides = [1, 1]} : vector<8x96xf32> to vector<8x8xf32>
    %100 = vector.extract_strided_slice %46 {offsets = [0, 88], sizes = [8, 8], strides = [1, 1]} : vector<8x96xf32> to vector<8x8xf32>
    %101 = tpu.transpose %99, [1, 0] : vector<8x8xf32> -> vector<8x8xf32>
    %cst_36 = arith.constant dense<0.000000e+00> : vector<8x8xf32>
    %102 = tpu.matmul %98, %101, %cst_36 {dimension_numbers = #tpu.dot_dimension_numbers<[1], [0], [0], [1], [0, 0, 1, 1], [], []>} : vector<8x8xf32>, vector<8x8xf32>, vector<8x8xf32> -> vector<8x8xf32>
    %cst_37 = arith.constant dense<0xFF800000> : vector<8xf32>
    %103 = vector.multi_reduction <maximumf>, %102, %cst_37 [1] : vector<8x8xf32> to vector<8xf32>
    %104 = vector.shape_cast %103 : vector<8xf32> to vector<8x1xf32>
    %105 = vector.broadcast %104 : vector<8x1xf32> to vector<8x8xf32>
    %106 = arith.subf %102, %105 : vector<8x8xf32>
    %107 = math.exp %106 : vector<8x8xf32>
    %cst_38 = arith.constant dense<0.000000e+00> : vector<8xf32>
    %108 = vector.multi_reduction <add>, %107, %cst_38 [1] : vector<8x8xf32> to vector<8xf32>
    %109 = vector.shape_cast %108 : vector<8xf32> to vector<8x1xf32>
    %cst_39 = arith.constant 1.000000e+00 : f32
    %110 = vector.broadcast %cst_39 : f32 to vector<8x1xf32>
    %111 = arith.divf %110, %109 : vector<8x1xf32>
    %112 = vector.broadcast %111 : vector<8x1xf32> to vector<8x8xf32>
    %113 = arith.mulf %107, %112 : vector<8x8xf32>
    %cst_40 = arith.constant dense<0.000000e+00> : vector<8x8xf32>
    %114 = tpu.matmul %113, %100, %cst_40 {dimension_numbers = #tpu.dot_dimension_numbers<[1], [0], [0], [1], [0, 0, 1, 1], [], []>} : vector<8x8xf32>, vector<8x8xf32>, vector<8x8xf32> -> vector<8x8xf32>
    %115 = tpu.concatenate %63, %80, %97, %114 in 1 : vector<8x8xf32>, vector<8x8xf32>, vector<8x8xf32>, vector<8x8xf32> -> vector<8x32xf32>
    %c0_41 = arith.constant 0 : index
    %c0_42 = arith.constant 0 : index
    %116 = vector.load %arg7[%c0_41, %c0_42] : memref<32x32xf32, #tpu.memory_space<vmem>>, vector<32x32xf32>
    %cst_43 = arith.constant dense<0.000000e+00> : vector<8x32xf32>
    %117 = tpu.matmul %115, %116, %cst_43 {dimension_numbers = #tpu.dot_dimension_numbers<[1], [0], [0], [1], [0, 0, 1, 1], [], []>} : vector<8x32xf32>, vector<32x32xf32>, vector<8x32xf32> -> vector<8x32xf32>
    %c0_44 = arith.constant 0 : index
    %c0_45 = arith.constant 0 : index
    %118 = vector.load %arg8[%c0_44, %c0_45] : memref<1x32xf32, #tpu.memory_space<vmem>>, vector<1x32xf32>
    %119 = vector.broadcast %118 : vector<1x32xf32> to vector<8x32xf32>
    %120 = arith.addf %117, %119 : vector<8x32xf32>
    %121 = vector.broadcast %16 : vector<1x32xf32> to vector<8x32xf32>
    %122 = arith.mulf %121, %120 : vector<8x32xf32>
    %123 = arith.addf %1, %122 : vector<8x32xf32>
    %cst_46 = arith.constant dense<0.000000e+00> : vector<8xf32>
    %124 = vector.multi_reduction <add>, %123, %cst_46 [1] : vector<8x32xf32> to vector<8xf32>
    %125 = vector.shape_cast %124 : vector<8xf32> to vector<8x1xf32>
    %cst_47 = arith.constant 3.200000e+01 : f32
    %126 = vector.broadcast %cst_47 : f32 to vector<8x1xf32>
    %127 = arith.divf %125, %126 : vector<8x1xf32>
    %128 = vector.broadcast %127 : vector<8x1xf32> to vector<8x32xf32>
    %129 = arith.subf %123, %128 : vector<8x32xf32>
    %130 = arith.mulf %129, %129 : vector<8x32xf32>
    %cst_48 = arith.constant dense<0.000000e+00> : vector<8xf32>
    %131 = vector.multi_reduction <add>, %130, %cst_48 [1] : vector<8x32xf32> to vector<8xf32>
    %132 = vector.shape_cast %131 : vector<8xf32> to vector<8x1xf32>
    %cst_49 = arith.constant 3.200000e+01 : f32
    %133 = vector.broadcast %cst_49 : f32 to vector<8x1xf32>
    %134 = arith.divf %132, %133 : vector<8x1xf32>
    %cst_50 = arith.constant 9.99999997E-7 : f32
    %135 = vector.broadcast %cst_50 : f32 to vector<8x1xf32>
    %136 = arith.addf %134, %135 : vector<8x1xf32>
    %137 = math.rsqrt %136 : vector<8x1xf32>
    %138 = vector.broadcast %137 : vector<8x1xf32> to vector<8x32xf32>
    %139 = arith.mulf %129, %138 : vector<8x32xf32>
    %cst_51 = arith.constant 1.000000e+00 : f32
    %140 = vector.broadcast %cst_51 : f32 to vector<1x32xf32>
    %141 = arith.addf %140, %18 : vector<1x32xf32>
    %142 = vector.broadcast %141 : vector<1x32xf32> to vector<8x32xf32>
    %143 = arith.mulf %139, %142 : vector<8x32xf32>
    %144 = vector.broadcast %17 : vector<1x32xf32> to vector<8x32xf32>
    %145 = arith.addf %143, %144 : vector<8x32xf32>
    %c0_52 = arith.constant 0 : index
    %c0_53 = arith.constant 0 : index
    %146 = vector.load %arg9[%c0_52, %c0_53] : memref<32x128xf32, #tpu.memory_space<vmem>>, vector<32x128xf32>
    %cst_54 = arith.constant dense<0.000000e+00> : vector<8x128xf32>
    %147 = tpu.matmul %145, %146, %cst_54 {dimension_numbers = #tpu.dot_dimension_numbers<[1], [0], [0], [1], [0, 0, 1, 1], [], []>} : vector<8x32xf32>, vector<32x128xf32>, vector<8x128xf32> -> vector<8x128xf32>
    %c0_55 = arith.constant 0 : index
    %c0_56 = arith.constant 0 : index
    %148 = vector.load %arg10[%c0_55, %c0_56] : memref<1x128xf32, #tpu.memory_space<vmem>>, vector<1x128xf32>
    %149 = vector.broadcast %148 : vector<1x128xf32> to vector<8x128xf32>
    %150 = arith.addf %147, %149 : vector<8x128xf32>
    %151 = arith.mulf %150, %150 : vector<8x128xf32>
    %152 = arith.mulf %150, %151 : vector<8x128xf32>
    %cst_57 = arith.constant 4.471500e-02 : f32
    %153 = vector.broadcast %cst_57 : f32 to vector<8x128xf32>
    %154 = arith.mulf %153, %152 : vector<8x128xf32>
    %155 = arith.addf %150, %154 : vector<8x128xf32>
    %cst_58 = arith.constant 0.797884583 : f32
    %156 = vector.broadcast %cst_58 : f32 to vector<8x128xf32>
    %157 = arith.mulf %156, %155 : vector<8x128xf32>
    %158 = math.tanh %157 : vector<8x128xf32>
    %cst_59 = arith.constant 1.000000e+00 : f32
    %159 = vector.broadcast %cst_59 : f32 to vector<8x128xf32>
    %160 = arith.addf %159, %158 : vector<8x128xf32>
    %cst_60 = arith.constant 5.000000e-01 : f32
    %161 = vector.broadcast %cst_60 : f32 to vector<8x128xf32>
    %162 = arith.mulf %161, %160 : vector<8x128xf32>
    %163 = arith.mulf %150, %162 : vector<8x128xf32>
    %c0_61 = arith.constant 0 : index
    %c0_62 = arith.constant 0 : index
    %164 = vector.load %arg11[%c0_61, %c0_62] : memref<128x32xf32, #tpu.memory_space<vmem>>, vector<128x32xf32>
    %cst_63 = arith.constant dense<0.000000e+00> : vector<8x32xf32>
    %165 = tpu.matmul %163, %164, %cst_63 {dimension_numbers = #tpu.dot_dimension_numbers<[1], [0], [0], [1], [0, 0, 1, 1], [], []>} : vector<8x128xf32>, vector<128x32xf32>, vector<8x32xf32> -> vector<8x32xf32>
    %c0_64 = arith.constant 0 : index
    %c0_65 = arith.constant 0 : index
    %166 = vector.load %arg12[%c0_64, %c0_65] : memref<1x32xf32, #tpu.memory_space<vmem>>, vector<1x32xf32>
    %167 = vector.broadcast %166 : vector<1x32xf32> to vector<8x32xf32>
    %168 = arith.addf %165, %167 : vector<8x32xf32>
    %169 = vector.broadcast %19 : vector<1x32xf32> to vector<8x32xf32>
    %170 = arith.mulf %169, %168 : vector<8x32xf32>
    %171 = arith.addf %123, %170 : vector<8x32xf32>
    %c0_66 = arith.constant 0 : index
    %c0_67 = arith.constant 0 : index
    %c0_68 = arith.constant 0 : index
    %172 = vector.load %arg13[%c0_66, %c0_67, %c0_68] : memref<1x8x32xf32, #tpu.memory_space<vmem>>, vector<1x8x32xf32>
    %173 = vector.shape_cast %172 : vector<1x8x32xf32> to vector<8x32xf32>
    %174 = vector.shape_cast %171 : vector<8x32xf32> to vector<1x8x32xf32>
    tpu.vector_store %arg13[%c0_66, %c0_67, %c0_68], %174 {strides = array<i32>} : memref<1x8x32xf32, #tpu.memory_space<vmem>>, vector<1x8x32xf32>,
    return
  }
  func.func @transform_0(%arg0: i32) -> (i32, i32, i32) {
    %c0_i32 = arith.constant 0 : i32
    %c0_i32_0 = arith.constant 0 : i32
    %c0_i32_1 = arith.constant 0 : i32
    return %arg0, %c0_i32, %c0_i32_0 : i32, i32, i32
  }
  func.func @transform_1(%arg0: i32) -> (i32, i32, i32) {
    %c0_i32 = arith.constant 0 : i32
    %c0_i32_0 = arith.constant 0 : i32
    %c0_i32_1 = arith.constant 0 : i32
    return %arg0, %c0_i32, %c0_i32_0 : i32, i32, i32
  }
  func.func @transform_2(%arg0: i32) -> (i32, i32) {
    %c0_i32 = arith.constant 0 : i32
    %c0_i32_0 = arith.constant 0 : i32
    %c0_i32_1 = arith.constant 0 : i32
    return %c0_i32, %c0_i32_0 : i32, i32
  }
  func.func @transform_3(%arg0: i32) -> (i32, i32) {
    %c0_i32 = arith.constant 0 : i32
    %c0_i32_0 = arith.constant 0 : i32
    %c0_i32_1 = arith.constant 0 : i32
    return %c0_i32, %c0_i32_0 : i32, i32
  }
  func.func @transform_4(%arg0: i32) -> (i32, i32) {
    %c0_i32 = arith.constant 0 : i32
    %c0_i32_0 = arith.constant 0 : i32
    %c0_i32_1 = arith.constant 0 : i32
    return %c0_i32, %c0_i32_0 : i32, i32
  }
  func.func @transform_5(%arg0: i32) -> (i32, i32) {
    %c0_i32 = arith.constant 0 : i32
    %c0_i32_0 = arith.constant 0 : i32
    %c0_i32_1 = arith.constant 0 : i32
    return %c0_i32, %c0_i32_0 : i32, i32
  }
  func.func @transform_6(%arg0: i32) -> (i32, i32) {
    %c0_i32 = arith.constant 0 : i32
    %c0_i32_0 = arith.constant 0 : i32
    %c0_i32_1 = arith.constant 0 : i32
    return %c0_i32, %c0_i32_0 : i32, i32
  }
  func.func @transform_7(%arg0: i32) -> (i32, i32) {
    %c0_i32 = arith.constant 0 : i32
    %c0_i32_0 = arith.constant 0 : i32
    %c0_i32_1 = arith.constant 0 : i32
    return %c0_i32, %c0_i32_0 : i32, i32
  }
  func.func @transform_8(%arg0: i32) -> (i32, i32) {
    %c0_i32 = arith.constant 0 : i32
    %c0_i32_0 = arith.constant 0 : i32
    %c0_i32_1 = arith.constant 0 : i32
    return %c0_i32, %c0_i32_0 : i32, i32
  }
  func.func @transform_9(%arg0: i32) -> (i32, i32) {
    %c0_i32 = arith.constant 0 : i32
    %c0_i32_0 = arith.constant 0 : i32
    %c0_i32_1 = arith.constant 0 : i32
    return %c0_i32, %c0_i32_0 : i32, i32
  }
  func.func @transform_10(%arg0: i32) -> (i32, i32) {
    %c0_i32 = arith.constant 0 : i32
    %c0_i32_0 = arith.constant 0 : i32
    %c0_i32_1 = arith.constant 0 : i32
    return %c0_i32, %c0_i32_0 : i32, i32
  }
  func.func @transform_11(%arg0: i32) -> (i32, i32) {
    %c0_i32 = arith.constant 0 : i32
    %c0_i32_0 = arith.constant 0 : i32
    %c0_i32_1 = arith.constant 0 : i32
    return %c0_i32, %c0_i32_0 : i32, i32
  }
  func.func @transform_12(%arg0: i32) -> (i32, i32, i32) {
    %c0_i32 = arith.constant 0 : i32
    %c0_i32_0 = arith.constant 0 : i32
    %c0_i32_1 = arith.constant 0 : i32
    return %arg0, %c0_i32, %c0_i32_0 : i32, i32, i32
  }
}

</mosaic_0001>

<bundles_post_ra>
// kernel: tpu_custom_call.1
= control target key start
LH: loop header
LB: loop body
LE: loop exit
PB: predicated region body
PF: predicated region fallthrough
CT: control target
= control target key end

     0   :  { %s2020_s0 = inlined_call_operand.hbm [shape: f32[2,8,32], index: 0, kind: input, shape index: {}]   ;;  %s2021_s1 = inlined_call_operand.hbm [shape: f32[2,1,32], index: 1, kind: input, shape index: {}]   ;;  %s2022_s2 = inlined_call_operand.vmem [shape: f32[32,192], index: 2, kind: input, shape index: {}]   ;;  %s2023_s3 = inlined_call_operand.hbm [shape: f32[1,192], index: 3, kind: input, shape index: {}]   ;;  %s2024_s4 = inlined_call_operand.vmem [shape: f32[32,96], index: 4, kind: input, shape index: {}]   ;;  %s2025_s5 = inlined_call_operand.vmem [shape: f32[1,96], index: 5, kind: input, shape index: {}]   ;;  %s2026_s6 = inlined_call_operand.vmem [shape: f32[32,32], index: 6, kind: input, shape index: {}]   ;;  %s2027_s7 = inlined_call_operand.vmem [shape: f32[1,32], index: 7, kind: input, shape index: {}]   ;;  %s2028_s8 = inlined_call_operand.vmem [shape: f32[32,128], index: 8, kind: input, shape index: {}]   ;;  %s2029_s9 = inlined_call_operand.vmem [shape: f32[1,128], index: 9, kind: input, shape index: {}]   ;;  %s2030_s10 = inlined_call_operand.vmem [shape: f32[128,32], index: 10, kind: input, shape index: {}]   ;;  %s2031_s11 = inlined_call_operand.vmem [shape: f32[1,32], index: 11, kind: input, shape index: {}]   ;;  %s2032_s12 = inlined_call_operand.hbm [shape: f32[2,8,32], index: 12, kind: output, shape index: {}]  }
   0x1   :  { %2042 = sst [smem:[#allocation20_spill]] %s2023_s3 }
   0x2   :  { %2043 = sst [smem:[#allocation21_spill]] %s2029_s9 }
   0x3   :  { %2044 = sst [smem:[#allocation22_spill]] %s2031_s11 }
   0x4   :  { %2045 = sst [smem:[#allocation23_spill]] %s2032_s12 }
   0x5   :  { %17 = vsyncpa [#allocation3], 0 }
   0x6   :  { %19 = vsyncpa [#allocation3 + $0x1], 0 }
   0x7   :  { %20 = vsyncpa [#allocation6], 0 }
   0x8   :  { %22 = vsyncpa [#allocation6 + $0x1], 0 }
   0x9   :  { %23 = vsyncpa [#allocation4], 0 }
   0xa   :  { %25 = vsyncpa [#allocation4 + $0x1], 0  ;;  %s1629_s21 = smov 0   ;;  %s1631_s22 = smov 0  }
   0xb   :  { %s1633_s23 = smov 0   ;;  %s1635_s24 = smov 0  }
   0xc LB: > { %2046 = sst [smem:[#allocation13_spill]] %s1533_s21  ;;  %s1650_s25 = sadd.s32 4294967295, %s1545_s24   ;;  %s1545_s24 = sphi %s1635_s24, %s2067_s24   ;;  %s1541_s23 = sphi %s1633_s23, %s2069_s23   ;;  %s1537_s22 = sphi %s1631_s22, %s2071_s22   ;;  %s1533_s21 = sphi %s1629_s21, %s2070_s21  }
   0xd   : > { %2047 = sst [smem:[#allocation14_spill]] %s1541_s23  ;;  %s1239_s26 = sadd.s32 4294967294, %s1545_s24  }
   0xe   : > { %2048 = sst [smem:[#allocation15_spill]] %s1545_s24  ;;  %p51_p0 = scmp.ne.s32.totalorder %s1537_s22, %s1533_s21 }
   0xf   : > { %p52_p1 = scmp.eq.s32.totalorder %s1650_s25, 0  ;;  %p311_p2 = scmp.eq.s32.totalorder %s1650_s25, 1 }
  0x10   : > { %p317_p3 = scmp.eq.s32.totalorder %s1239_s26, 1  ;;  %p1240_p5 = scmp.ge.s32.totalorder %s1545_s24, 1 }
  0x11   : > { %p1659_p4 = por %p52_p1, %p51_p0  ;;  %p324_p7 = scmp.lt.s32.totalorder %s1545_s24, 3 }
  0x12   : > { %p1664_p6 = por %p317_p3, %p51_p0  ;;  %s2052_s3 = sld [smem:[#allocation20_spill]] }
  0x13   : > { %p1672_p8 = pnand %p1240_p5, %p324_p7  ;;  %s1547_s15 = smov [#allocation7]  }
  0x14   : > { %s2050_s28 = scalar_select %p1664_p6, 1, 0 }
  0x15   : > { %p1281_p10 = pneg %p1672_p8  ;;  %s341_s16 = sshll.u32 %s1547_s15, 4  ;;  %s342_s16 = int_to_ptr.vmem [resolvable:$true] %s341_s16 }
  0x16   : > { %2051 = sst [smem:[#allocation16_spill]] %s2050_s28  ;;  %s1682_s17 = sadd.s32 1, %s1545_s24  }
  0x17   : > { %p1282_p11 = pnand %p1281_p10, %p52_p1  ;;  %2054 = sst [smem:[#allocation17_spill]] %s1682_s17 }
  0x18   : > { %s339_s13 = sshll.u32 %s2052_s3, 4  ;;  %s38_s18 = sadd.s32 1, %s1541_s23  ;;  %s340_s13 = int_to_ptr.hbm [resolvable:$true] %s339_s13 }
  0x19   : > { %s35_s19 = ssub.s32 %s1545_s24, %s1682_s17  ;;  %p45_p13 = scmp.ne.s32.totalorder %s1541_s23, %s1537_s22 }
  0x1a   : > { %1284 = dma.hbm_to_vmem [thread:$0]  (!%p1282_p11), %s340_s13, 32, %s342_s16, [#allocation6]  }
  0x1b   : > { %p36_p12 = scmp.eq.s32.totalorder %s35_s19, 0  ;;  %p46_p0 = scmp.eq.s32.totalorder %s1545_s24, 0 }
  0x1c   : > { %p1297_p3 = scmp.lt.s32.totalorder %s1545_s24, 2  ;;  %p1696_p7 = por %p311_p2, %p45_p13 }
  0x1d   : > { %s1692_s20 = scalar_select %p36_p12, %s1541_s23, %s38_s18  }
  0x1e   : > { %p47_p5 = por %p46_p0, %p45_p13  ;;  %s1701_s29 = sand.u32 1, %s1541_s23  }
  0x1f   : > { %2055 = sst [smem:[#allocation18_spill]] %s1692_s20  ;;  %s1244_s30 = sshll.u32 %s1545_s24, 3 }
  0x20   : > { %s2056_s26 = scalar_select %p1696_p7, 1, 0 }
  0x21   : > { %s1243_s13 = sshll.u32 %s1701_s29, 3  ;;  %s384_s19 = scalar_lea.hbm %s2020_s0, %s1244_s30 }
  0x22   : > { %2057 = sst [smem:[#allocation19_spill]] %s2056_s26  ;;  %s386_s3 = sshll.u32 %s384_s19, 4  ;;  %s387_s3 = int_to_ptr.hbm [resolvable:$true] %s386_s3 }
  0x23   : > { %s380_s17 = scalar_lea.vmem [#allocation2], %s1243_s13  ;;  %p1710_p2 = pnand %p1297_p3, %p47_p5 }
  0x24   : > { %s388_s18 = sshll.u32 %s380_s17, 4  ;;  %s395_s23 = sand.u32 1, %s1545_s24   ;;  %s389_s18 = int_to_ptr.vmem [resolvable:$true] %s388_s18 }
  0x25   : > { %s401_s12 = scalar_lea.hbm %s2021_s1, %s1545_s24  ;;  %s377_s26 = scalar_lea.sflag [#allocation3], %s1701_s29 }
  0x26   : > { %s1411_s15 = sshra.s32 %s387_s3, 4  ;;  %p1415_p11 = pneg %p1710_p2  ;;  %s1412_s15 = int_to_ptr.hbm [resolvable:$true] %s1411_s15 }
  0x27   : > { %s1413_s30 = scalar_lea.hbm %s1412_s15, 8  ;;  %s1418_s16 = scalar_lea.hbm %s2020_s0, 16 }
  0x28   : > { %p1414_p10 = scmp.ne.s32.totalorder %s1412_s15, %s1413_s30  ;;  %p1419_p0 = scmp.lt.s32.totalorder %s1412_s15, %s2020_s0 }
  0x29   : > { %p1420_p3 = scmp.lt.s32.totalorder %s1418_s16, %s1413_s30 }
  0x2a   : > { %p1416_p12 = pnand %p1415_p11, %p1414_p10 }
  0x2b   : > { %p1421_p5 = por %p1420_p3, %p1419_p0 }
  0x2c   : > { %p1417_p13 = pneg %p1416_p12 }
  0x2e   : > { %p1422_p9 = pnand %p1421_p5, %p1417_p13 }
  0x30   : > { %1425 = shalt.err (!%p1422_p9)
}
  0x31   : > { %1288 = dma.hbm_to_vmem [thread:$0]  (!%p1710_p2), %s387_s3, 128, %s389_s18, %s377_s26  }
  0x32   : > { %s403_s21 = sshll.u32 %s401_s12, 4  ;;  %s398_s28 = scalar_lea.vmem [#allocation5], %s1701_s29  ;;  %s404_s21 = int_to_ptr.hbm [resolvable:$true] %s403_s21 }
  0x33   : > { %s405_s24 = sshll.u32 %s398_s28, 4  ;;  %s396_s17 = scalar_lea.sflag [#allocation6], %s395_s23  ;;  %s406_s24 = int_to_ptr.vmem [resolvable:$true] %s405_s24 }
  0x34   : > { %s1441_s13 = sshra.s32 %s404_s21, 4  ;;  %s1448_s30 = scalar_lea.hbm %s2021_s1, 2  ;;  %s1442_s13 = int_to_ptr.hbm [resolvable:$true] %s1441_s13 }
  0x35   : > { %s1443_s9 = scalar_lea.hbm %s1442_s13, 1  ;;  %p1449_p9 = scmp.lt.s32.totalorder %s1442_s13, %s2021_s1 }
  0x36   : > { %p1444_p10 = scmp.ne.s32.totalorder %s1442_s13, %s1443_s9  ;;  %p1450_p0 = scmp.lt.s32.totalorder %s1448_s30, %s1443_s9 }
  0x38   : > { %p1446_p12 = pnand %p1444_p10, %p1415_p11  ;;  %p1451_p3 = por %p1450_p0, %p1449_p9 }
  0x3a   : > { %p1447_p13 = pneg %p1446_p12 }
  0x3c   : > { %p1452_p5 = pnand %p1451_p3, %p1447_p13 }
  0x3e   : > { %1455 = shalt.err (!%p1452_p5)
}
  0x3f   : > { %1291 = dma.hbm_to_vmem [thread:$0]  (!%p1710_p2), %s404_s21, 16, %s406_s24, %s396_s17  }
  0x40   : > { %414 = sbr.rel (%p1672_p8) target bundleno = 2344 (0x928), region = 68  ;;  %s1748_s12 = sand.u32 (!%p1672_p8), 1, %s1537_s22  }
  0x41   : > { %s1246_s23 = sshll.u32 (!%p1672_p8), %s1748_s12, 3  ;;  %s417_s26 = scalar_lea.sflag (!%p1672_p8), [#allocation3], %s1748_s12 }
  0x42   : > { %s420_s9 = scalar_lea.vmem (!%p1672_p8), [#allocation2], %s1246_s23 }
  0x45   : > { %1516 = dma.done.wait (%p1659_p4), %s417_s26, 128  }
  0x46   : > { %1518 = vsyncadd (%p1659_p4), %s417_s26, 4294967168  ;;  %s426_s24 = sand.u32 1, %s1650_s25   ;;  %s429_s20 = scalar_lea.vmem [#allocation5], %s1748_s12 }
  0x47   : > { %s427_s14 = scalar_lea.sflag [#allocation6], %s426_s24 }
  0x48   : > { %1520 = dma.done.wait (%p1659_p4), %s427_s14, 16  }
  0x49   : > { %1522 = vsyncadd (%p1659_p4), %s427_s14, 4294967280 }
  0x4a   : > { %1524 = dma.done.wait (%p52_p1), [#allocation6], 32  }
  0x4b   : > { %1526 = vsyncadd (%p52_p1), [#allocation6], 4294967264  ;;  %vm516_vm0 = vcmask 261120   ;;  %v1768_v0 = vld [vmem:[%s420_s9] sm:$0xff]  ;;  %v508_v1 = vld [vmem:[%s2022_s2 + $0x30] sm:$0xff]  ;;  %v1548_v21 = vmov 32.0  }
  0x4c   : > { %v506_v2 = vld [vmem:[%s2022_s2 + $0x20] sm:$0xff]  ;;  %v560_v3 = vsel %vm516_vm0, %v1768_v0, 0.0  ;;  %532 = vmatpush.msra.mxu1 %v508_v1  ;;  %v504_v4 = vld [vmem:[%s2022_s2 + $0x10] sm:$0xff]  ;;  %s1549_s11 = smov 96   ;;  %v601_v39 = vld [vmem:[%s2024_s4 + $0x18] sm:$0xff]  ;;  %s1550_s18 = smov 80  }
  0x4d   : > { %v481_v5 = vld [vmem:[%s429_s20] sm:$0x1]  ;;  %561 = vadd.xlane.f32.xlu0 %v560_v3  ;;  %v1793_v33 = vld [vmem:[#allocation7] sm:$0x3]  ;;  %621 = vmatpush.msra.mxu2 %v601_v39  ;;  %v599_v44 = vld [vmem:[%s2024_s4 + $0x8] sm:$0xff]  ;;  %s1551_s19 = smov 88  }
  0x4e   : > { %v1249_v6 = vmul.f32 -1.442695, %v481_v5  ;;  %533 = vmatpush.msra.mxu1 %v506_v2  ;;  %v502_v7 = vld [vmem:[%s2022_s2] sm:$0xff]  ;;  %v512_v34 = vperm.slane %v1793_v33, 0  ;;  %v600_v40 = vld [vmem:[%s2024_s4 + $0x10] sm:$0xff]  ;;  %s1552_s21 = smov 120  }
  0x4f   : > { %622 = vmatpush.msra.mxu2 %v600_v40  ;;  %v598_v45 = vld [vmem:[%s2024_s4] sm:$0xff]  ;;  %s1553_s27 = smov 112   ;;  %s1554_s28 = smov 72   ;;  %vm632_vm9 = vcmask 64512  }
  0x50   : > { %1353 = vpow2.f32 %v1249_v6  ;;  %534 = vmatpush.msra.mxu1 %v504_v4  ;;  %v1349_v58 = vld [vmem:[%s2025_s5] ss:$0 sm:$0xff]  ;;  %s1555_s17 = smov 104   ;;  %s1556_s13 = smov 56  }
  0x51   : > { %623 = vmatpush.msra.mxu2 %v599_v44  ;;  %s1557_s20 = smov 64   ;;  %s1558_s29 = smov 40  }
  0x52   : > { %535 = vmatpush.msra.mxu1 %v502_v7  ;;  %s1563_s14 = smov 32   ;;  %s2059_s30 = sld [smem:[#allocation21_spill]] }
  0x53   : > { %624 = vmatpush.msra.mxu2 %v598_v45  ;;  %s2060_s26 = sld [smem:[#allocation22_spill]]  ;;  %s1268_s24 = sshll.u32 %s1650_s25, 3 }
  0x56   : > { %v1354_v8 = vpop.eup %1353 }
  0x57   : > { %v485_v9 = vadd.f32 1.0, %v1354_v8 }
  0x59   : > { %1355 = vrcp.f32 %v485_v9  ;;  %v497_v12 = vand.u32 2147483648, %v485_v9  ;;  %vm491_vm1 = vweird.f32 %v485_v9  ;;  %v495_v14 = vand.u32 2147483647, %v485_v9 }
  0x5a   : > { %1357 = vrcp.f32 %v1548_v21 }
  0x5b   : > { %v498_v16 = vor.u32 1.1754944e-38, %v497_v12  ;;  %vm496_vm4 = vcmp.eq.f32.partialorder %v495_v14, 8.507059e+37 }
  0x5f   : > { %v1356_v10 = vpop.eup %1355 }
  0x60   : > { %v487_v11 = vmul.f32 %v1356_v10, %v485_v9  ;;  %vm492_vm2 = vweird.f32 %v1356_v10  ;;  %v1358_v22 = vpop.eup %1357 }
  0x61   : > { %vm493_vm3 = vmor %vm491_vm1, %vm492_vm2  ;;  %v564_v23 = vmul.f32 32.0, %v1358_v22  ;;  %vm568_vm5 = vweird.f32 %v1358_v22 }
  0x62   : > { %v488_v13 = vsub.f32 1.0, %v487_v11 }
  0x63   : > { %v565_v24 = vsub.f32 1.0, %v564_v23 }
  0x64   : > { %v489_v15 = vmul.f32 %v1356_v10, %v488_v13 }
  0x65   : > { %v566_v25 = vmul.f32 %v1358_v22, %v565_v24 }
  0x66   : > { %v490_v17 = vadd.f32 %v1356_v10, %v489_v15  ;;  %v509_v15 = vld [vmem:[%s2022_s2 + $0x38] sm:$0xff] }
  0x67   : > { %v567_v26 = vadd.f32 %v1358_v22, %v566_v25  ;;  %552 = vmatpush.msrb.mxu1 %v509_v15 }
  0x68   : > { %v494_v18 = vsel %vm493_vm3, %v1356_v10, %v490_v17  ;;  %v507_v17 = vld [vmem:[%s2022_s2 + $0x28] sm:$0xff] }
  0x69   : > { %v499_v19 = vsel %vm496_vm4, %v498_v16, %v494_v18  ;;  %v1788_v27 = vsel %vm568_vm5, %v1358_v22, %v567_v26  ;;  %553 = vmatpush.msrb.mxu1 %v507_v17  ;;  %v505_v18 = vld [vmem:[%s2022_s2 + $0x18] sm:$0xff] }
  0x6a   : > { %v1784_v20 = vmul.f32 %v499_v19, %v481_v5  ;;  %v503_v19 = vld [vmem:[%s2022_s2 + $0x8] sm:$0xff] }
  0x6b   : > { %554 = vmatpush.msrb.mxu1 %v505_v18 }
  0x6c   : > { %1250 = vmatmul.msk.f32.vlgmr.msra.gmra.mxu1 %vm516_vm0, %v1784_v20 }
  0x6d   : > { %555 = vmatpush.msrb.mxu1 %v503_v19 }
  0x74   : > { %1251 = vmatmul.msk.f32.vlgmr.msrb.gmra.mxu1 %vm516_vm0, %v1784_v20 }
  0xc0   : > { %v562_v28 = vpop.xlane.xlu0 %561 }
  0xc1   : > { %v570_v29 = vmul.f32 %v1788_v27, %v562_v28 }
  0xc3   : > { %v571_v30 = vsub.f32 %v1768_v0, %v570_v29 }
  0xc5   : > { %v572_v31 = vmul.f32 %v571_v30, %v571_v30 }
  0xc7   : > { %v573_v32 = vsel %vm516_vm0, %v572_v31, 0.0 }
  0xc8   : > { %574 = vadd.xlane.f32.xlu0 %v573_v32 }
  0xe9   : > { %v537_v35 = vpop.f32.mrf.mxu1 }
  0xea   : > { %v538_v36 = vadd.f32 %v537_v35, %v512_v34 }
  0xec   : > { %v589_v37 = vadd.f32 1.0, %v538_v36  ;;  %v1810_v55 = vperm.slane %v538_v36, 0 }
  0xee   : > { %v590_v38 = vperm.slane %v589_v37, 0 }
  0xf0   : > { %592 = vrot.lane.b32.xlu1 %v590_v38, %s1549_s11 }
 0x13b   : > { %v575_v41 = vpop.xlane.xlu0 %574 }
 0x13c   : > { %v576_v42 = vmul.f32 %v575_v41, %v1788_v27 }
 0x13e   : > { %v577_v43 = vadd.f32 1e-06, %v576_v42 }
 0x140   : > { %1359 = vrsqrt.f32 %v577_v43  ;;  %vm584_vm6 = vweird.f32 %v577_v43 }
 0x146   : > { %v1360_v46 = vpop.eup %1359 }
 0x147   : > { %v579_v47 = vmul.f32 %v1360_v46, %v577_v43  ;;  %vm585_vm7 = vweird.f32 %v1360_v46 }
 0x148   : > { %vm586_vm8 = vmor %vm584_vm6, %vm585_vm7 }
 0x149   : > { %v580_v48 = vmul.f32 %v1360_v46, %v579_v47 }
 0x14b   : > { %v581_v49 = vmul.f32 0.5, %v580_v48 }
 0x14d   : > { %v582_v50 = vsub.f32 1.5, %v581_v49 }
 0x14f   : > { %v583_v51 = vmul.f32 %v1360_v46, %v582_v50 }
 0x151   : > { %v587_v52 = vsel %vm586_vm8, %v1360_v46, %v583_v51 }
 0x152   : > { %v588_v53 = vmul.f32 %v587_v52, %v571_v30 }
 0x162   : > { %v593_v54 = vpop.permute.xlu1 %592 }
 0x163   : > { %v595_v56 = vmul.f32 %v593_v54, %v588_v53 }
 0x165   : > { %v597_v57 = vadd.f32 %v1810_v55, %v595_v56 }
 0x167   : > { %1252 = vmatmul.msk.f32.vlgmr.msra.gmra.mxu2 %vm516_vm0, %v597_v57 }
 0x1ea   : > { %v626_v59 = vpop.f32.mrf.mxu2 }
 0x1eb   : > { %v1817_v60 = vadd.f32 %v1349_v58, %v626_v59 }
 0x1ed   : > { %789 = vrot.lane.b32.xlu0 %v1817_v60, %s1550_s18  ;;  %710 = vrot.lane.b32.xlu2 %v1817_v60, %s1551_s19  ;;  %s1559_s18 = smov 48   ;;  %s1560_s19 = smov 8  }
 0x1ee   : > { %630 = vrot.lane.b32.xlu1 %v1817_v60, %s1549_s11 }
 0x1f5   : > { %708 = vrot.lane.b32.xlu2 %v1817_v60, %s1552_s21  ;;  %s1561_s21 = smov 24  }
 0x1f6   : > { %787 = vrot.lane.b32.xlu1 %v1817_v60, %s1553_s27  ;;  %s1562_s27 = smov 16  }
 0x1fd   : > { %868 = vrot.lane.b32.xlu2 %v1817_v60, %s1554_s28 }
 0x1fe   : > { %866 = vrot.lane.b32.xlu1 %v1817_v60, %s1555_s17 }
 0x247   : > { %v711_v61 = vpop.permute.xlu2 %710 }
 0x248   : > { %1256 = vmatpush.xpose.msk.msrb.mxu2 %vm632_vm9, %v711_v61 }
 0x24f   : > { %v709_v62 = vpop.permute.xlu2 %708 }
 0x250   : > { %1257 = vmatmul.msk.f32.vlgmr.msrb.gmra.mxu2 %vm632_vm9, %v709_v62 }
 0x257   : > { %v869_v63 = vpop.permute.xlu2 %868 }
 0x258   : > { %1262 = vmatpush.xpose.msk.msra.mxu0 %vm632_vm9, %v869_v63 }
 0x25f   : > { %v790_v1 = vpop.permute.xlu0 %789 }
 0x260   : > { %v631_v2 = vpop.permute.xlu1 %630  ;;  %1259 = vmatpush.xpose.msk.msra.mxu2 %vm632_vm9, %v790_v1 }
 0x261   : > { %1253 = vmatpush.xpose.msk.msra.mxu3 %vm632_vm9, %v631_v2 }
 0x264   : > { %1254 = vmatmul.msk.f32.vlgmr.msra.gmra.mxu3 %vm632_vm9, %v1817_v60 }
 0x268   : > { %v788_v3 = vpop.permute.xlu1 %787 }
 0x269   : > { %1260 = vmatmul.msk.f32.vlgmr.msra.gmra.mxu2 %vm632_vm9, %v788_v3 }
 0x270   : > { %v867_v4 = vpop.permute.xlu1 %866 }
 0x271   : > { %1263 = vmatmul.msk.f32.vlgmr.msra.gmra.mxu0 %vm632_vm9, %v867_v4 }
 0x2d3   : > { %v733_v5 = vpop.f32.mrf.mxu2 }
 0x2d4   : > { %v736_v6 = vsel %vm632_vm9, %v733_v5, -inf }
 0x2d5   : > { %737 = vmax.xlane.f32.xlu1 %v736_v6 }
 0x2e7   : > { %v654_v7 = vpop.f32.mrf.mxu3 }
 0x2e8   : > { %v657_v8 = vsel %vm632_vm9, %v654_v7, -inf }
 0x2e9   : > { %658 = vmax.xlane.f32.xlu2 %v657_v8 }
 0x2ec   : > { %v812_v9 = vpop.f32.mrf.mxu2 }
 0x2ed   : > { %v815_v10 = vsel %vm632_vm9, %v812_v9, -inf }
 0x2ee   : > { %816 = vmax.xlane.f32.xlu0 %v815_v10  ;;  %v891_v11 = vpop.f32.mrf.mxu0 }
 0x2ef   : > { %v894_v12 = vsel %vm632_vm9, %v891_v11, -inf }
 0x2f1   : > { %895 = vmax.xlane.f32.xlu2 %v894_v12 }
 0x302   : > { %761 = vrot.lane.b32.xlu0 %v1817_v60, %s1556_s13 }
 0x348   : > { %v738_v13 = vpop.xlane.xlu1 %737 }
 0x349   : > { %v739_v14 = vsub.f32 %v733_v5, %v738_v13 }
 0x34b   : > { %v740_v16 = vmul.f32 1.442695, %v739_v14 }
 0x34d   : > { %1361 = vpow2.f32 %v740_v16 }
 0x353   : > { %v1362_v21 = vpop.eup %1361 }
 0x354   : > { %v742_v22 = vsel %vm632_vm9, %v1362_v21, 0.0 }
 0x355   : > { %743 = vadd.xlane.f32.xlu1 %v742_v22 }
 0x35c   : > { %v659_v23 = vpop.xlane.xlu2 %658 }
 0x35d   : > { %v660_v30 = vsub.f32 %v654_v7, %v659_v23 }
 0x35f   : > { %v661_v32 = vmul.f32 1.442695, %v660_v30 }
 0x361   : > { %v817_v24 = vpop.xlane.xlu0 %816 }
 0x362   : > { %v818_v25 = vsub.f32 %v812_v9, %v817_v24 }
 0x364   : > { %v819_v26 = vmul.f32 1.442695, %v818_v25  ;;  %v896_v28 = vpop.xlane.xlu2 %895 }
 0x365   : > { %v897_v29 = vsub.f32 %v891_v11, %v896_v28 }
 0x366   : > { %1363 = vpow2.f32 %v819_v26 }
 0x367   : > { %v898_v31 = vmul.f32 1.442695, %v897_v29 }
 0x369   : > { %1365 = vpow2.f32 %v898_v31  ;;  %v1879_v31 = vpop.f32.mrf.mxu1 }
 0x36a   : > { %1367 = vpow2.f32 %v661_v32 }
 0x36c   : > { %v1856_v34 = vpop.eup %1363 }
 0x36d   : > { %v821_v35 = vsel %vm632_vm9, %v1856_v34, 0.0 }
 0x36e   : > { %822 = vadd.xlane.f32.xlu0 %v821_v35  ;;  %682 = vrot.lane.b32.xlu1 %v1817_v60, %s1557_s20 }
 0x36f   : > { %v1862_v20 = vpop.eup %1365 }
 0x370   : > { %v900_v36 = vsel %vm632_vm9, %v1862_v20, 0.0  ;;  %v1866_v38 = vpop.eup %1367 }
 0x371   : > { %901 = vadd.xlane.f32.xlu2 %v900_v36  ;;  %v663_v39 = vsel %vm632_vm9, %v1866_v38, 0.0 }
 0x374   : > { %v762_v37 = vpop.permute.xlu0 %761 }
 0x375   : > { %782 = vmatpush.msra.mxu1 %v762_v37  ;;  %v965_v37 = vld [vmem:[%s2026_s6 + $0x18] sm:$0xff] }
 0x376   : > { %985 = vmatpush.msrb.mxu2 %v965_v37 }
 0x379   : > { %664 = vadd.xlane.f32.xlu2 %v663_v39  ;;  %v962_v39 = vld [vmem:[%s2026_s6] sm:$0xff] }
 0x382   : > { %919 = vrot.lane.b32.xlu0 %v1817_v60, %s1558_s29 }
 0x391   : > { %840 = vrot.lane.b32.xlu2 %v1817_v60, %s1559_s18  ;;  %s2062_s18 = sld [smem:[#allocation23_spill]] }
 0x3c8   : > { %v744_v40 = vpop.xlane.xlu1 %743 }
 0x3c9   : > { %1369 = vrcp.f32 %v744_v40  ;;  %v756_v44 = vand.u32 2147483648, %v744_v40  ;;  %v754_v46 = vand.u32 2147483647, %v744_v40  ;;  %vm750_vm11 = vweird.f32 %v744_v40 }
 0x3cb   : > { %v757_v48 = vor.u32 1.1754944e-38, %v756_v44  ;;  %vm755_vm13 = vcmp.eq.f32.partialorder %v754_v46, 8.507059e+37  ;;  %v1350_v46 = vld [vmem:[%s2027_s7] ss:$0 sm:$0xff] }
 0x3cf   : > { %v1370_v41 = vpop.eup %1369 }
 0x3d0   : > { %v746_v42 = vmul.f32 %v1370_v41, %v744_v40  ;;  %vm751_vm10 = vweird.f32 %v1370_v41 }
 0x3d1   : > { %vm752_vm12 = vmor %vm750_vm11, %vm751_vm10 }
 0x3d2   : > { %v747_v43 = vsub.f32 1.0, %v746_v42 }
 0x3d4   : > { %v748_v45 = vmul.f32 %v1370_v41, %v747_v43 }
 0x3d6   : > { %v749_v47 = vadd.f32 %v1370_v41, %v748_v45 }
 0x3d8   : > { %v753_v49 = vsel %vm752_vm12, %v1370_v41, %v749_v47  ;;  %vm958_vm12 = vcmask 130048  }
 0x3d9   : > { %v758_v50 = vsel %vm755_vm13, %v757_v48, %v753_v49  ;;  %vm960_vm13 = vcmask 195584  }
 0x3da   : > { %v760_v51 = vmul.f32 %v1362_v21, %v758_v50 }
 0x3dc   : > { %1258 = vmatmul.msk.f32.vlgmr.msra.gmra.mxu1 %vm632_vm9, %v760_v51 }
 0x3e0   : > { %v683_v52 = vpop.permute.xlu1 %682 }
 0x3e1   : > { %703 = vmatpush.msrb.mxu3 %v683_v52  ;;  %v823_v53 = vpop.xlane.xlu0 %822 }
 0x3e2   : > { %v835_v22 = vand.u32 2147483648, %v823_v53  ;;  %vm829_vm8 = vweird.f32 %v823_v53  ;;  %v833_v24 = vand.u32 2147483647, %v823_v53 }
 0x3e4   : > { %v902_v54 = vpop.xlane.xlu2 %901  ;;  %v836_v28 = vor.u32 1.1754944e-38, %v835_v22  ;;  %vm834_vm11 = vcmp.eq.f32.partialorder %v833_v24, 8.507059e+37  ;;  %v1082_v22 = vld [vmem:[%s2030_s10 + $0x48] sm:$0xff]  ;;  %v1080_v24 = vld [vmem:[%s2030_s10 + $0x38] sm:$0xff] }
 0x3e5   : > { %1371 = vrcp.f32 %v902_v54  ;;  %v914_v61 = vand.u32 2147483648, %v902_v54  ;;  %v912_v1 = vand.u32 2147483647, %v902_v54  ;;  %vm908_vm15 = vweird.f32 %v902_v54 }
 0x3e6   : > { %1373 = vrcp.f32 %v823_v53 }
 0x3e7   : > { %v915_v4 = vor.u32 1.1754944e-38, %v914_v61  ;;  %vm913_vm2 = vcmp.eq.f32.partialorder %v912_v1, 8.507059e+37  ;;  %v1033_v61 = vld [vmem:[%s2028_s8] sm:$0xff]  ;;  %v1086_v1 = vld [vmem:[%s2030_s10 + $0x68] sm:$0xff] }
 0x3eb   : > { %v1372_v56 = vpop.eup %1371 }
 0x3ec   : > { %v904_v57 = vmul.f32 %v1372_v56, %v902_v54  ;;  %v665_v58 = vpop.xlane.xlu2 %664  ;;  %v1374_v59 = vpop.eup %1373  ;;  %vm909_vm14 = vweird.f32 %v1372_v56 }
 0x3ed   : > { %1375 = vrcp.f32 %v665_v58  ;;  %v825_v62 = vmul.f32 %v1374_v59, %v823_v53  ;;  %vm910_vm1 = vmor %vm908_vm15, %vm909_vm14  ;;  %v677_v13 = vand.u32 2147483648, %v665_v58  ;;  %v675_v16 = vand.u32 2147483647, %v665_v58 }
 0x3ee   : > { %v905_v60 = vsub.f32 1.0, %v904_v57  ;;  %vm671_vm4 = vweird.f32 %v665_v58  ;;  %vm830_vm6 = vweird.f32 %v1374_v59 }
 0x3ef   : > { %v826_v5 = vsub.f32 1.0, %v825_v62  ;;  %v678_v18 = vor.u32 1.1754944e-38, %v677_v13  ;;  %vm676_vm7 = vcmp.eq.f32.partialorder %v675_v16, 8.507059e+37  ;;  %vm831_vm10 = vmor %vm829_vm8, %vm830_vm6  ;;  %v1088_v62 = vld [vmem:[%s2030_s10 + $0x78] sm:$0xff] }
 0x3f0   : > { %v906_v63 = vmul.f32 %v1372_v56, %v905_v60  ;;  %v1034_v60 = vld [vmem:[%s2028_s8 + $0x8] sm:$0xff]  ;;  %1093 = vmatpush.msrb.mxu0 %v1088_v62 }
 0x3f1   : > { %v827_v14 = vmul.f32 %v1374_v59, %v826_v5 }
 0x3f2   : > { %v907_v2 = vadd.f32 %v1372_v56, %v906_v63  ;;  %v1087_v63 = vld [vmem:[%s2030_s10 + $0x70] sm:$0xff] }
 0x3f3   : > { %v1376_v3 = vpop.eup %1375  ;;  %v828_v19 = vadd.f32 %v1374_v59, %v827_v14  ;;  %1094 = vmatpush.msrb.mxu0 %v1087_v63 }
 0x3f4   : > { %v911_v6 = vsel %vm910_vm1, %v1372_v56, %v907_v2  ;;  %v667_v7 = vmul.f32 %v1376_v3, %v665_v58  ;;  %v920_v8 = vpop.permute.xlu0 %919  ;;  %v841_v9 = vpop.permute.xlu2 %840  ;;  %vm672_vm3 = vweird.f32 %v1376_v3 }
 0x3f5   : > { %v916_v10 = vsel %vm913_vm2, %v915_v4, %v911_v6  ;;  %861 = vmatpush.msra.mxu3 %v841_v9  ;;  %940 = vmatpush.msrb.mxu1 %v920_v8  ;;  %vm673_vm5 = vmor %vm671_vm4, %vm672_vm3  ;;  %v832_v26 = vsel %vm831_vm10, %v1374_v59, %v828_v19  ;;  %v513_v6 = vperm.slane %v1793_v33, 1  ;;  %v1085_v33 = vld [vmem:[%s2030_s10 + $0x60] sm:$0xff]  ;;  %v1084_v19 = vld [vmem:[%s2030_s10 + $0x58] sm:$0xff] }
 0x3f6   : > { %v668_v11 = vsub.f32 1.0, %v667_v7  ;;  %v918_v12 = vmul.f32 %v1862_v20, %v916_v10  ;;  %v837_v29 = vsel %vm834_vm11, %v836_v28, %v832_v26  ;;  %1095 = vmatpush.msrb.mxu0 %v1086_v1  ;;  %v1078_v26 = vld [vmem:[%s2030_s10 + $0x28] sm:$0xff]  ;;  %v1077_v28 = vld [vmem:[%s2030_s10 + $0x20] sm:$0xff] }
 0x3f7   : > { %v839_v30 = vmul.f32 %v1856_v34, %v837_v29  ;;  %v964_v34 = vld [vmem:[%s2026_s6 + $0x10] sm:$0xff]  ;;  %v558_v9 = vadd.f32 %v1879_v31, %v513_v6  ;;  %v1076_v29 = vld [vmem:[%s2030_s10 + $0x18] sm:$0xff]  ;;  %v1074_v31 = vld [vmem:[%s2030_s10 + $0x8] sm:$0xff] }
 0x3f8   : > { %v669_v15 = vmul.f32 %v1376_v3, %v668_v11  ;;  %1264 = vmatmul.msk.f32.vlgmr.msrb.gmra.mxu1 %vm632_vm9, %v918_v12  ;;  %986 = vmatpush.msrb.mxu2 %v964_v34 }
 0x3f9   : > { %v1025_v12 = vadd.f32 1.0, %v558_v9  ;;  %1096 = vmatpush.msrb.mxu0 %v1085_v33 }
 0x3fa   : > { %v670_v17 = vadd.f32 %v1376_v3, %v669_v15 }
 0x3fb   : > { %v1026_v15 = vperm.slane %v1025_v12, 0  ;;  %1097 = vmatpush.msrb.mxu0 %v1084_v19 }
 0x3fc   : > { %v674_v21 = vsel %vm673_vm5, %v1376_v3, %v670_v17 }
 0x3fd   : > { %v679_v23 = vsel %vm676_vm7, %v678_v18, %v674_v21  ;;  %v1083_v21 = vld [vmem:[%s2030_s10 + $0x50] sm:$0xff] }
 0x3fe   : > { %v681_v25 = vmul.f32 %v1866_v38, %v679_v23  ;;  %v963_v38 = vld [vmem:[%s2026_s6 + $0x8] sm:$0xff]  ;;  %1098 = vmatpush.msrb.mxu0 %v1083_v21  ;;  %v1081_v23 = vld [vmem:[%s2030_s10 + $0x40] sm:$0xff] }
 0x3ff   : > { %987 = vmatpush.msrb.mxu2 %v963_v38 }
 0x400   : > { %1255 = vmatmul.msk.f32.vlgmr.msrb.gmra.mxu3 %vm632_vm9, %v681_v25  ;;  %1099 = vmatpush.msrb.mxu0 %v1082_v22  ;;  %v1079_v25 = vld [vmem:[%s2030_s10 + $0x30] sm:$0xff] }
 0x401   : > { %988 = vmatpush.msrb.mxu2 %v962_v39 }
 0x402   : > { %1100 = vmatpush.msrb.mxu0 %v1081_v23 }
 0x404   : > { %1101 = vmatpush.msrb.mxu0 %v1080_v24 }
 0x406   : > { %1102 = vmatpush.msrb.mxu0 %v1079_v25 }
 0x408   : > { %1261 = vmatmul.msk.f32.vlgmr.msra.gmra.mxu3 %vm632_vm9, %v839_v30  ;;  %1103 = vmatpush.msrb.mxu0 %v1078_v26  ;;  %v1075_v30 = vld [vmem:[%s2030_s10 + $0x10] sm:$0xff] }
 0x40a   : > { %1104 = vmatpush.msrb.mxu0 %v1077_v28 }
 0x40c   : > { %1105 = vmatpush.msrb.mxu0 %v1076_v29 }
 0x40e   : > { %1106 = vmatpush.msrb.mxu0 %v1075_v30 }
 0x410   : > { %1107 = vmatpush.msrb.mxu0 %v1074_v31 }
 0x459   : > { %v784_v32 = vpop.f32.mrf.mxu1 }
 0x45a   : > { %946 = vrot.lane.b32.xlu1 %v784_v32, %s1560_s19  ;;  %v1073_v32 = vld [vmem:[%s2030_s10] sm:$0xff]  ;;  %s1136_s19 = scalar_lea.hbm %s2062_s18, %s1268_s24 }
 0x45b   : > { %1108 = vmatpush.msrb.mxu0 %v1073_v32  ;;  %s1140_s28 = sshll.u32 %s1136_s19, 4  ;;  %s1141_s28 = int_to_ptr.hbm [resolvable:$true] %s1140_s28 }
 0x45c   : > { %s1485_s17 = sshra.s32 %s1141_s28, 4  ;;  %s1486_s17 = int_to_ptr.hbm [resolvable:$true] %s1485_s17 }
 0x45d   : > { %p1492_p2 = scmp.lt.s32.totalorder %s1486_s17, %s2062_s18 }
 0x475   : > { %v942_v35 = vpop.f32.mrf.mxu1 }
 0x476   : > { %954 = vrot.lane.b32.xlu0 %v942_v35, %s1561_s21  ;;  %v1351_v35 = vld [vmem:[%s2059_s30] ss:$0 sm:$0xff]  ;;  %s479_s21 = scalar_lea.vmem [#allocation8], %s1246_s23  ;;  %s1491_s23 = scalar_lea.hbm %s2062_s18, 16 }
 0x483   : > { %v705_v20 = vpop.f32.mrf.mxu3 }
 0x48b   : > { %v863_v36 = vpop.f32.mrf.mxu3 }
 0x48c   : > { %950 = vrot.lane.b32.xlu2 %v863_v36, %s1562_s27  ;;  %s1138_s27 = sshll.u32 %s479_s21, 4  ;;  %s1139_s27 = int_to_ptr.vmem [resolvable:$true] %s1138_s27 }
 0x4cc   : > { %v947_v40 = vpop.permute.xlu1 %946 }
 0x4cd   : > { %v957_v41 = vsel %vm632_vm9, %v705_v20, %v947_v40 }
 0x4e6   : > { %v951_v42 = vpop.permute.xlu2 %950 }
 0x4e7   : > { %v959_v43 = vsel %vm958_vm12, %v957_v41, %v951_v42 }
 0x4e8   : > { %v955_v44 = vpop.permute.xlu0 %954 }
 0x4e9   : > { %v961_v45 = vsel %vm960_vm13, %v959_v43, %v955_v44 }
 0x4ea   : > { %1265 = vmatmul.msk.f32.vlgmr.msrb.gmra.mxu2 %vm516_vm0, %v961_v45  ;;  %v1352_v45 = vld [vmem:[%s2060_s26] ss:$0 sm:$0xff] }
 0x56d   : > { %v990_v47 = vpop.f32.mrf.mxu2 }
 0x56e   : > { %v991_v48 = vadd.f32 %v1350_v46, %v990_v47 }
 0x570   : > { %994 = vrot.lane.b32.xlu1 %v991_v48, %s1557_s20  ;;  %v1113_v48 = vperm.slane %v558_v9, 0 }
 0x5e2   : > { %v995_v49 = vpop.permute.xlu1 %994 }
 0x5e3   : > { %v997_v50 = vmul.f32 %v995_v49, %v1810_v55 }
 0x5e5   : > { %999 = vrot.lane.b32.xlu2 %v997_v50, %s1557_s20 }
 0x5ed   : > { %1029 = vrot.lane.b32.xlu2 %v1810_v55, %s1563_s14  ;;  %v1036_v55 = vld [vmem:[%s2028_s8 + $0x18] sm:$0xff] }
 0x5ee   : > { %1056 = vmatpush.msrb.mxu3 %v1036_v55 }
 0x63f   : > { %v1000_v51 = vpop.permute.xlu2 %999 }
 0x640   : > { %v1904_v52 = vadd.f32 %v1000_v51, %v1768_v0  ;;  %v1035_v0 = vld [vmem:[%s2028_s8 + $0x10] sm:$0xff] }
 0x641   : > { %1057 = vmatpush.msrb.mxu3 %v1035_v0 }
 0x642   : > { %v1003_v53 = vsel %vm516_vm0, %v1904_v52, 0.0 }
 0x643   : > { %1004 = vadd.xlane.f32.xlu0 %v1003_v53  ;;  %1058 = vmatpush.msrb.mxu3 %v1034_v60 }
 0x645   : > { %1059 = vmatpush.msrb.mxu3 %v1033_v61 }
 0x647   : > { %v1030_v17 = vpop.permute.xlu2 %1029 }
 0x6b6   : > { %v1005_v54 = vpop.xlane.xlu0 %1004 }
 0x6b7   : > { %v1006_v56 = vmul.f32 %v1005_v54, %v1788_v27 }
 0x6b9   : > { %v1007_v57 = vsub.f32 %v1904_v52, %v1006_v56 }
 0x6bb   : > { %v1008_v58 = vmul.f32 %v1007_v57, %v1007_v57 }
 0x6bd   : > { %v1009_v59 = vsel %vm516_vm0, %v1008_v58, 0.0 }
 0x6be   : > { %1010 = vadd.xlane.f32.xlu1 %v1009_v59 }
 0x731   : > { %v1011_v2 = vpop.xlane.xlu1 %1010 }
 0x732   : > { %v1012_v3 = vmul.f32 %v1011_v2, %v1788_v27 }
 0x734   : > { %v1013_v4 = vadd.f32 1e-06, %v1012_v3 }
 0x736   : > { %1377 = vrsqrt.f32 %v1013_v4  ;;  %vm1020_vm14 = vweird.f32 %v1013_v4 }
 0x73c   : > { %v1378_v5 = vpop.eup %1377 }
 0x73d   : > { %v1015_v7 = vmul.f32 %v1378_v5, %v1013_v4  ;;  %vm1021_vm9 = vweird.f32 %v1378_v5 }
 0x73e   : > { %vm1022_vm15 = vmor %vm1020_vm14, %vm1021_vm9 }
 0x73f   : > { %v1016_v8 = vmul.f32 %v1378_v5, %v1015_v7 }
 0x741   : > { %v1017_v10 = vmul.f32 0.5, %v1016_v8 }
 0x743   : > { %v1018_v11 = vsub.f32 1.5, %v1017_v10 }
 0x745   : > { %v1019_v13 = vmul.f32 %v1378_v5, %v1018_v11 }
 0x747   : > { %v1023_v14 = vsel %vm1022_vm15, %v1378_v5, %v1019_v13 }
 0x748   : > { %v1024_v27 = vmul.f32 %v1023_v14, %v1007_v57 }
 0x74a   : > { %v1027_v16 = vmul.f32 %v1026_v15, %v1024_v27 }
 0x74c   : > { %v1032_v18 = vadd.f32 %v1030_v17, %v1027_v16 }
 0x74e   : > { %1266 = vmatmul.msk.f32.vlgmr.msrb.gmra.mxu3 %vm516_vm0, %v1032_v18 }
 0x7d1   : > { %v1061_v20 = vpop.f32.mrf.mxu3 }
 0x7d2   : > { %v1062_v36 = vadd.f32 %v1351_v35, %v1061_v20 }
 0x7d4   : > { %v1064_v37 = vmul.f32 %v1062_v36, %v1062_v36 }
 0x7d6   : > { %v1065_v34 = vmul.f32 %v1064_v37, %v1062_v36 }
 0x7d8   : > { %v1066_v38 = vmul.f32 0.044715, %v1065_v34 }
 0x7da   : > { %v1067_v39 = vadd.f32 %v1066_v38, %v1062_v36 }
 0x7dc   : > { %v1068_v40 = vmul.f32 0.7978846, %v1067_v39 }
 0x7de   : > { %1379 = vtanh.f32 %v1068_v40 }
 0x7e4   : > { %v1380_v41 = vpop.eup %1379 }
 0x7e5   : > { %v1070_v42 = vadd.f32 1.0, %v1380_v41 }
 0x7e7   : > { %v1071_v43 = vmul.f32 0.5, %v1070_v42 }
 0x7e9   : > { %v1072_v44 = vmul.f32 %v1071_v43, %v1062_v36 }
 0x7eb   : > { %1109 = vmatmul.f32.vlgmr.msrb.gmra.mxu0 %v1072_v44 }
 0x868   : > { %v1110_v46 = vpop.f32.mrf.mxu0 }
 0x869   : > { %v1111_v47 = vadd.f32 %v1352_v45, %v1110_v46 }
 0x86b   : > { %1115 = vrot.lane.b32.xlu2 %v1111_v47, %s1563_s14  ;;  %s1126_s14 = scalar_lea.sflag [#allocation4], %s1748_s12 }
 0x8c5   : > { %v1116_v49 = vpop.permute.xlu2 %1115 }
 0x8c6   : > { %v1118_v50 = vmul.f32 %v1116_v49, %v1113_v48 }
 0x8c8   : > { %1120 = vrot.lane.b32.xlu2 %v1118_v50, %s1549_s11  ;;  %s1487_s11 = scalar_lea.hbm %s1486_s17, 8 }
 0x8c9   : > { %p1488_p1 = scmp.ne.s32.totalorder %s1486_s17, %s1487_s11  ;;  %p1493_p11 = scmp.lt.s32.totalorder %s1491_s23, %s1487_s11 }
 0x8cb   : > { %p1489_p4 = pnand %p1488_p1, %p1696_p7  ;;  %p1494_p10 = por %p1493_p11, %p1492_p2 }
 0x8cd   : > { %p1490_p8 = pneg %p1489_p4 }
 0x8cf   : > { %p1495_p12 = pnand %p1494_p10, %p1490_p8 }
 0x922   : > { %v1121_v51 = vpop.permute.xlu2 %1120 }
 0x923   : > { %v1123_v53 = vadd.f32 %v1121_v51, %v1904_v52 }
 0x925   : > { %1124 = vst.msk [vmem:[%s479_s21] sm:$0xff] %vm516_vm0, %v1123_v53 }
 0x926   : > { %1498 = shalt.err (!%p1495_p12)
}
 0x927   : > { %1279 = dma.vmem_to_hbm [thread:$0]  (%p1696_p7), %s1139_s27, 128, %s1141_s28, %s1126_s14  }
 0x928 PF: > { %s2063_s12 = sld [smem:[#allocation13_spill]] }
 0x929   : > { %s2065_s3 = sld [smem:[#allocation15_spill]] }
 0x92e   : > { %s1152_s26 = sand.u32 1, %s2063_s12  }
 0x92f   : > { %p2066_p13 = scmp.ge.s32.totalorder %s2065_s3, 2  ;;  %s1153_s24 = scalar_lea.sflag [#allocation4], %s1152_s26 }
 0x931   : > { %p1293_p9 = pnand %p2066_p13, %p1664_p6 }
 0x933   : > { %p1294_p0 = pneg %p1293_p9 }
 0x935   : > { %1528 = dma.done.wait (%p1294_p0), %s1153_s24, 128  }
 0x936   : > { %1530 = vsyncadd (%p1294_p0), %s1153_s24, 4294967168  ;;  %s2067_s24 = sld [smem:[#allocation17_spill]]  ;;  %s2070_s21 = smov %s1537_s22 }
 0x937   : > { %s2068_s20 = sld [smem:[#allocation14_spill]] }
 0x938   : > { %s2069_s23 = sld [smem:[#allocation18_spill]] }
 0x93c   : > { %p28_p3 = scmp.ge.s32.totalorder %s2067_s24, 4  }
 0x93d   : > { %s2071_s22 = smov %s2068_s20 }
 0x93e   :  { %30 = sbr.rel (!%p28_p3) target bundleno = 12 (0xc), region = 130 }
 0x943   :  { %1159 = vsyncpa [#allocation3], 1 }
 0x944   :  { %1161 = vsyncpa [#allocation3 + $0x1], 1 }
 0x945   :  { %1162 = vsyncpa [#allocation6], 1 }
 0x946   :  { %1164 = vsyncpa [#allocation6 + $0x1], 1 }
 0x947   :  { %1165 = vsyncpa [#allocation4], 1 }
 0x948   :  { %1167 = vsyncpa [#allocation4 + $0x1], 1 }

</bundles_post_ra>
